<compile_context>
chip_gen: v6e
topology: v6e:2x2x1
jax: 0.10.0
libtpu: 0.0.40
codegen_flags: <defaults>
</compile_context>

<pallas_src>
import functools

import jax
import jax.numpy as jnp
from jax.experimental import pallas as pl
from jax.experimental.pallas import tpu as pltpu

LEAKY_SLOPE = 0.01  # nn.LeakyReLU default negative_slope


def _round_up(x, m):
    return (x + m - 1) // m * m


def _make_mlp_kernel(n_layers, act_flags):
    """Fused (Linear -> Dropout(p=0) -> LeakyReLU?) x n_layers over one row tile.

    Ref order: x_ref, (w0, b0), (w1, b1), ..., out_ref.
    """

    def kernel(*refs):
        x_ref = refs[0]
        out_ref = refs[-1]
        h = x_ref[...]                                   # [tile_m, f_in], bf16
        for i in range(n_layers):
            w_ref = refs[1 + 2 * i]                      # [f_in_i, f_out_i], bf16
            b_ref = refs[2 + 2 * i]                      # [1, f_out_i], f32
            # One bf16 MXU matmul per layer, f32 accumulation.
            acc = jnp.dot(h, w_ref[...], preferred_element_type=jnp.float32)
            acc = acc + b_ref[...]                       # f32 bias epilogue (one FMA)
            # Dropout(p=0) is the identity -- nothing to do.
            # TODO(synk): stochastic Dropout (p_dropout>0) not implemented; the
            # module default p_dropout=0 makes it an identity.
            if act_flags[i]:
                # LeakyReLU == max(h, slope*h) for 0 < slope < 1: single vmax
                # after the vmul instead of compare+select.
                acc = jnp.maximum(acc, LEAKY_SLOPE * acc)
            # Feed the next MXU matmul in bf16; final result stays f32.
            h = acc.astype(jnp.bfloat16) if i + 1 < n_layers else acc
        out_ref[...] = h.astype(out_ref.dtype)

    return kernel


def prepare_params(params):
    """One-time (call OUTSIDE jit) cast/reshape into kernel layout.

    W -> bfloat16 [f_in, f_out] (transpose of torch's [out, in]),
    b -> float32 [1, f_out]  (epilogue stays f32).
    """
    return [
        (jnp.asarray(w, jnp.bfloat16), jnp.asarray(b, jnp.float32).reshape(1, -1))
        for (w, b) in params
    ]


def _pick_tile_m(m):
    """Row-tile heuristic: 128-512 rows, multiple of 8, >=2 grid steps if possible."""
    t = min(512, max(128, _round_up(m, 8)))
    if pl.cdiv(m, t) < 2 and m >= 16:
        # Keep at least two grid steps so ("parallel",) can split work across
        # v7x's two TensorCores even for small batches.
        t = _round_up(pl.cdiv(m, 2), 8)
    return min(t, _round_up(m, 8))


def mlp_forward(x, params, last_activation=True, tile_m=None):
    """MLP.forward.

    x: [..., f_in]; params: output of prepare_params()
    (list of (W bf16 [f_in, f_out], b f32 [1, f_out])).
    """
    n_layers = len(params)
    act_flags = tuple((i < n_layers - 1) or last_activation for i in range(n_layers))
    f_in = params[0][0].shape[0]
    f_out = params[-1][0].shape[1]

    lead_shape = x.shape[:-1]
    x2 = x.reshape(-1, f_in).astype(jnp.bfloat16)        # bf16 feeds the MXU
    m = x2.shape[0]
    if tile_m is None:
        tile_m = _pick_tile_m(m)
    grid = (pl.cdiv(m, tile_m),)   # edge block handled by Pallas; no host-side pad

    flat_args = [x2]
    in_specs = [pl.BlockSpec((tile_m, f_in), lambda i: (i, 0))]
    for (w, b) in params:
        cin, cout = w.shape
        flat_args.append(w)
        flat_args.append(b)
        # Constant index_map: fetched once, VMEM-resident across all grid steps.
        # For very wide layers, single-buffer these blocks (pl.Buffered(1)) or
        # stage into scratch to halve weight VMEM (irrelevant at demo sizes).
        in_specs.append(pl.BlockSpec((cin, cout), lambda i: (0, 0)))
        in_specs.append(pl.BlockSpec((1, cout), lambda i: (0, 0)))

    # VMEM budget (v7x has 64 MiB physical; default scoped limit is 32 MiB).
    widest = max(w.shape[1] for (w, _) in params)
    vmem_need = (
        2 * tile_m * f_in * 2                                   # x tile (bf16), dbl-buffered
        + 2 * tile_m * f_out * 4                                # out tile (f32), dbl-buffered
        + sum(w.size * 2 * 2 + b.size * 4 * 2 for (w, b) in params)  # weights/biases
        + tile_m * widest * (4 + 2)                             # widest f32 interm. + bf16 copy
    )
    vmem_limit = min(64 << 20, max(32 << 20, int(vmem_need * 2)))

    flops = 2 * m * sum(w.shape[0] * w.shape[1] for (w, _) in params)
    bytes_accessed = (
        x2.size * 2 + m * f_out * 4
        + sum(w.size * 2 + b.size * 4 for (w, b) in params)
    )

    out = pl.pallas_call(
        _make_mlp_kernel(n_layers, act_flags),
        out_shape=jax.ShapeDtypeStruct((m, f_out), jnp.float32),
        grid=grid,
        in_specs=in_specs,
        out_specs=pl.BlockSpec((tile_m, f_out), lambda i: (i, 0)),
        compiler_params=pltpu.CompilerParams(
            dimension_semantics=("parallel",),   # rows independent -> megacore
            vmem_limit_bytes=vmem_limit,
        ),
        cost_estimate=pl.CostEstimate(
            flops=flops, bytes_accessed=bytes_accessed, transcendentals=0),
    )(*flat_args)

    return out.reshape(lead_shape + (f_out,))


def _mlp_reference(x, params_f32, last_activation=True):
    """Pure-jnp f32 reference for correctness checking."""
    n_layers = len(params_f32)
    h = x.astype(jnp.float32)
    for i, (w, b) in enumerate(params_f32):
        h = h @ w + b
        if i < n_layers - 1 or last_activation:
            h = jnp.where(h >= 0, h, LEAKY_SLOPE * h)
    return h


def init_params(key, feature_lengths):
    """Deterministic synthetic parameters matching MLP's Linear shapes (f32).

    Weights are stored as [f_in, f_out] (transpose of torch's [out, in]) so the
    kernel computes x @ W directly.
    """
    params = []
    for i in range(len(feature_lengths) - 1):
        f_in, f_out = feature_lengths[i], feature_lengths[i + 1]
        key, kw, kb = jax.random.split(key, 3)
        bound = 1.0 / jnp.sqrt(f_in)
        w = jax.random.uniform(kw, (f_in, f_out), jnp.float32, -bound, bound)
        b = jax.random.uniform(kb, (f_out,), jnp.float32, -bound, bound)
        params.append((w, b))
    return params


if __name__ == "__main__":
    # Lane-dense demo sizes (feature widths multiples of 128), still small.
    feature_lengths = [128, 256, 128]
    batch = 64
    last_activation = True
    # p_dropout = 0 (module default): Dropout is the identity.

    key = jax.random.PRNGKey(0)
    key, kx, kp = jax.random.split(key, 3)
    params_f32 = init_params(kp, feature_lengths)
    params = prepare_params(params_f32)       # cast/reshape ONCE, outside jit
    x = jax.random.normal(kx, (batch, feature_lengths[0]), jnp.float32)

    fwd = jax.jit(functools.partial(mlp_forward, last_activation=last_activation))
    y = fwd(x, params)
    jax.block_until_ready(y)

    assert y.shape == (batch, feature_lengths[-1]), y.shape
    y_ref = _mlp_reference(x, params_f32, last_activation)
    # bf16 matmul inputs (f32 accumulation) -> loosen tolerance vs the f32 ref.
    err = float(jnp.max(jnp.abs(y - y_ref)))
    assert jnp.allclose(y, y_ref, atol=3e-2, rtol=3e-2), err
    print("KERNEL_OK")
</pallas_src>

<mosaic_0001>
module attributes {stable_mosaic.version = 11 : i64} {
  func.func @kernel(%arg0: i32, %arg1: memref<32x128xbf16, #tpu.memory_space<vmem>>, %arg2: memref<128x256xbf16, #tpu.memory_space<vmem>>, %arg3: memref<1x256xf32, #tpu.memory_space<vmem>>, %arg4: memref<256x128xbf16, #tpu.memory_space<vmem>>, %arg5: memref<1x128xf32, #tpu.memory_space<vmem>>, %arg6: memref<32x128xf32, #tpu.memory_space<vmem>>) attributes {dimension_semantics = [#tpu.dimension_semantics<parallel>], iteration_bounds = array<i64: 2>, scalar_prefetch = 0 : i64, scratch_operands = 0 : i64, tpu.core_type = #tpu.core_type<tc>, window_params = [{transform_indices = @transform_0, window_bounds = array<i64: 32, 128>}, {pipeline_mode = #tpu.pipeline_mode<synchronous>, transform_indices = @transform_1, window_bounds = array<i64: 128, 256>}, {pipeline_mode = #tpu.pipeline_mode<synchronous>, transform_indices = @transform_2, window_bounds = array<i64: 1, 256>}, {pipeline_mode = #tpu.pipeline_mode<synchronous>, transform_indices = @transform_3, window_bounds = array<i64: 256, 128>}, {pipeline_mode = #tpu.pipeline_mode<synchronous>, transform_indices = @transform_4, window_bounds = array<i64: 1, 128>}, {transform_indices = @transform_5, window_bounds = array<i64: 32, 128>}]} {
    %c0 = arith.constant 0 : index
    %c0_0 = arith.constant 0 : index
    %0 = vector.load %arg1[%c0, %c0_0] : memref<32x128xbf16, #tpu.memory_space<vmem>>, vector<32x128xbf16>
    %c0_1 = arith.constant 0 : index
    %c0_2 = arith.constant 0 : index
    %1 = vector.load %arg2[%c0_1, %c0_2] : memref<128x256xbf16, #tpu.memory_space<vmem>>, vector<128x256xbf16>
    %cst = arith.constant dense<0.000000e+00> : vector<32x256xf32>
    %2 = tpu.matmul %0, %1, %cst {dimension_numbers = #tpu.dot_dimension_numbers<[1], [0], [0], [1], [0, 0, 1, 1], [], []>} : vector<32x128xbf16>, vector<128x256xbf16>, vector<32x256xf32> -> vector<32x256xf32>
    %c0_3 = arith.constant 0 : index
    %c0_4 = arith.constant 0 : index
    %3 = vector.load %arg3[%c0_3, %c0_4] : memref<1x256xf32, #tpu.memory_space<vmem>>, vector<1x256xf32>
    %4 = vector.broadcast %3 : vector<1x256xf32> to vector<32x256xf32>
    %5 = arith.addf %2, %4 : vector<32x256xf32>
    %cst_5 = arith.constant 0.00999999977 : f32
    %6 = vector.broadcast %cst_5 : f32 to vector<32x256xf32>
    %7 = arith.mulf %6, %5 : vector<32x256xf32>
    %8 = arith.maximumf %5, %7 : vector<32x256xf32>
    %9 = arith.truncf %8 : vector<32x256xf32> to vector<32x256xbf16>
    %c0_6 = arith.constant 0 : index
    %c0_7 = arith.constant 0 : index
    %10 = vector.load %arg4[%c0_6, %c0_7] : memref<256x128xbf16, #tpu.memory_space<vmem>>, vector<256x128xbf16>
    %cst_8 = arith.constant dense<0.000000e+00> : vector<32x128xf32>
    %11 = tpu.matmul %9, %10, %cst_8 {dimension_numbers = #tpu.dot_dimension_numbers<[1], [0], [0], [1], [0, 0, 1, 1], [], []>} : vector<32x256xbf16>, vector<256x128xbf16>, vector<32x128xf32> -> vector<32x128xf32>
    %c0_9 = arith.constant 0 : index
    %c0_10 = arith.constant 0 : index
    %12 = vector.load %arg5[%c0_9, %c0_10] : memref<1x128xf32, #tpu.memory_space<vmem>>, vector<1x128xf32>
    %13 = vector.broadcast %12 : vector<1x128xf32> to vector<32x128xf32>
    %14 = arith.addf %11, %13 : vector<32x128xf32>
    %cst_11 = arith.constant 0.00999999977 : f32
    %15 = vector.broadcast %cst_11 : f32 to vector<32x128xf32>
    %16 = arith.mulf %15, %14 : vector<32x128xf32>
    %17 = arith.maximumf %14, %16 : vector<32x128xf32>
    %c0_12 = arith.constant 0 : index
    %c0_13 = arith.constant 0 : index
    %18 = vector.load %arg6[%c0_12, %c0_13] : memref<32x128xf32, #tpu.memory_space<vmem>>, vector<32x128xf32>
    tpu.vector_store %arg6[%c0_12, %c0_13], %17 {strides = array<i32>} : memref<32x128xf32, #tpu.memory_space<vmem>>, vector<32x128xf32>,
    return
  }
  func.func @transform_0(%arg0: i32) -> (i32, i32) {
    %c0_i32 = arith.constant 0 : i32
    %c0_i32_0 = arith.constant 0 : i32
    return %arg0, %c0_i32 : i32, i32
  }
  func.func @transform_1(%arg0: i32) -> (i32, i32) {
    %c0_i32 = arith.constant 0 : i32
    %c0_i32_0 = arith.constant 0 : i32
    %c0_i32_1 = arith.constant 0 : i32
    return %c0_i32, %c0_i32_0 : i32, i32
  }
  func.func @transform_2(%arg0: i32) -> (i32, i32) {
    %c0_i32 = arith.constant 0 : i32
    %c0_i32_0 = arith.constant 0 : i32
    %c0_i32_1 = arith.constant 0 : i32
    return %c0_i32, %c0_i32_0 : i32, i32
  }
  func.func @transform_3(%arg0: i32) -> (i32, i32) {
    %c0_i32 = arith.constant 0 : i32
    %c0_i32_0 = arith.constant 0 : i32
    %c0_i32_1 = arith.constant 0 : i32
    return %c0_i32, %c0_i32_0 : i32, i32
  }
  func.func @transform_4(%arg0: i32) -> (i32, i32) {
    %c0_i32 = arith.constant 0 : i32
    %c0_i32_0 = arith.constant 0 : i32
    %c0_i32_1 = arith.constant 0 : i32
    return %c0_i32, %c0_i32_0 : i32, i32
  }
  func.func @transform_5(%arg0: i32) -> (i32, i32) {
    %c0_i32 = arith.constant 0 : i32
    %c0_i32_0 = arith.constant 0 : i32
    return %arg0, %c0_i32 : i32, i32
  }
}

</mosaic_0001>

<bundles_post_ra>
// kernel: mlp_forward.1
= control target key start
LH: loop header
LB: loop body
LE: loop exit
PB: predicated region body
PF: predicated region fallthrough
CT: control target
= control target key end

     0   :  { %10 = vsyncpa [#allocation3], 0  ;;  %s1255_s0 = inlined_call_operand.vmem [shape: bf16[64,128], index: 0, kind: input, shape index: {}]   ;;  %s1256_s1 = inlined_call_operand.hbm [shape: bf16[128,256], index: 1, kind: input, shape index: {}]   ;;  %s1257_s2 = inlined_call_operand.vmem [shape: f32[1,256], index: 2, kind: input, shape index: {}]   ;;  %s1258_s3 = inlined_call_operand.hbm [shape: bf16[256,128], index: 3, kind: input, shape index: {}]   ;;  %s1259_s4 = inlined_call_operand.vmem [shape: f32[1,128], index: 4, kind: input, shape index: {}]   ;;  %s1260_s5 = inlined_call_operand.hbm [shape: f32[64,128], index: 5, kind: output, shape index: {}]  }
   0x1   :  { %11 = vsyncpa [#allocation6], 0 }
   0x2   :  { %12 = vsyncpa [#allocation4], 0 }
   0x3   :  { %14 = vsyncpa [#allocation4 + $0x1], 0  ;;  %s1099_s18 = smov 0   ;;  %s1101_s19 = smov 0  }
   0x4   :  { %s1103_s20 = smov 0   ;;  %s1105_s21 = smov 0  }
   0x5 LB: > { %s1120_s22 = sadd.s32 4294967295, %s1057_s21   ;;  %s748_s23 = sadd.s32 4294967294, %s1057_s21   ;;  %s1057_s21 = sphi %s1105_s21, %s1274_s21   ;;  %s1053_s20 = sphi %s1103_s20, %s1273_s20   ;;  %s1049_s19 = sphi %s1101_s19, %s1272_s19   ;;  %s1045_s18 = sphi %s1099_s18, %s1271_s18  }
   0x6   : > { %s1124_s24 = sadd.s32 1, %s1057_s21   ;;  %s137_s25 = sadd.s32 1, %s1053_s20 }
   0x7   : > { %s134_s26 = ssub.s32 %s1057_s21, %s1124_s24  ;;  %p147_p0 = scmp.ne.s32.totalorder %s1053_s20, %s1049_s19 }
   0x8   : > { %p135_p1 = scmp.eq.s32.totalorder %s134_s26, 0  ;;  %p148_p2 = scmp.eq.s32.totalorder %s1120_s22, 1 }
   0x9   : > { %p153_p3 = scmp.ne.s32.totalorder %s1049_s19, %s1045_s18  ;;  %p154_p4 = scmp.eq.s32.totalorder %s748_s23, 1 }
   0xa   : > { %s1135_s27 = scalar_select %p135_p1, %s1053_s20, %s137_s25  }
   0xb   : > { %p1137_p5 = por %p148_p2, %p147_p0  ;;  %p1141_p6 = por %p154_p4, %p153_p3 }
   0xc   : > { %p749_p7 = scmp.ge.s32.totalorder %s1057_s21, 1  ;;  %p161_p8 = scmp.lt.s32.totalorder %s1057_s21, 3 }
   0xd   : > { %s1263_s29 = scalar_select %p1141_p6, 1, 0 }
   0xe   : > { %p1261_p9 = scmp.eq.s32.totalorder %s1120_s22, 0  ;;  %p1148_p10 = pnand %p749_p7, %p161_p8 }
   0xf   : > { %s1059_s6 = smov [#allocation2]   ;;  %s1060_s9 = smov [#allocation5]  }
  0x10   : > { %s173_s7 = sshll.u32 %s1059_s6, 4  ;;  %p838_p11 = pneg %p1148_p10  ;;  %s174_s7 = int_to_ptr.vmem [resolvable:$true] %s173_s7 }
  0x11   : > { %s189_s10 = sshll.u32 %s1060_s9, 4  ;;  %s948_s11 = scalar_lea.vmem %s174_s7, 2048  ;;  %s190_s10 = int_to_ptr.vmem [resolvable:$true] %s189_s10 }
  0x12   : > { %p1156_p12 = pnand %p1261_p9, %p838_p11  ;;  %p949_p0 = scmp.ne.s32.totalorder %s174_s7, %s948_s11 }
  0x13   : > { %p956_p3 = scmp.lt.s32.totalorder %s174_s7, %s174_s7  ;;  %p957_p4 = scmp.lt.s32.totalorder %s948_s11, %s948_s11 }
  0x14   : > { %p939_p13 = pneg %p1156_p12 }
  0x15   : > { %p958_p7 = por %p957_p4, %p956_p3 }
  0x16   : > { %p951_p1 = pnand %p949_p0, %p939_p13 }
  0x18   : > { %p952_p2 = pneg %p951_p1 }
  0x1a   : > { %p959_p8 = pnand %p958_p7, %p952_p2 }
  0x1c   : > { %962 = shalt.err (!%p959_p8)
}
  0x1d   : > { %s1061_s12 = smov 128   ;;  %s1062_s13 = smov 8  }
  0x1e   : > { %841 = dma.hbm_to_vmem [thread:$0]  (!%p1156_p12), %s1256_s1, 2048, %s174_s7, [#allocation3], %s1061_s12, %s1061_s12, %s1062_s13  }
  0x1f   : > { %s974_s16 = scalar_lea.vmem %s190_s10, 2048  ;;  %p982_p9 = scmp.lt.s32.totalorder %s190_s10, %s190_s10 }
  0x20   : > { %p975_p11 = scmp.ne.s32.totalorder %s190_s10, %s974_s16  ;;  %p983_p6 = scmp.lt.s32.totalorder %s974_s16, %s974_s16 }
  0x22   : > { %p977_p0 = pnand %p975_p11, %p939_p13  ;;  %p984_p3 = por %p983_p6, %p982_p9 }
  0x24   : > { %p978_p1 = pneg %p977_p0 }
  0x26   : > { %p985_p2 = pnand %p984_p3, %p978_p1 }
  0x28   : > { %988 = shalt.err (!%p985_p2)
}
  0x29   : > { %s1063_s17 = smov 64   ;;  %s1064_s23 = smov 4  }
  0x2a   : > { %844 = dma.hbm_to_vmem [thread:$0]  (!%p1156_p12), %s1258_s3, 2048, %s190_s10, [#allocation6], %s1063_s17, %s1063_s17, %s1064_s23  }
  0x2b   : > { %217 = sbr.rel (%p1148_p10) target bundleno = 522 (0x20a), region = 40  ;;  %p1266_p4 = scmp.eq.s32.totalorder (!%p1148_p10), %s1120_s22, 0 }
  0x30   : > { %1032 = dma.done.wait (%p1266_p4), [#allocation3], 2048   ;;  %p1267_p13 = pmov %p1266_p4 }
  0x31   : > { %p1268_p6 = pmov %p1266_p4 }
  0x32   : > { %1034 = vsyncadd (%p1267_p13), [#allocation3], 4294965248 }
  0x33   : > { %1036 = dma.done.wait (%p1268_p6), [#allocation6], 2048   ;;  %p1269_p9 = pmov %p1266_p4 }
  0x34   : > { %v1065_v0 = vmov 0   ;;  %s757_s6 = sshll.u32 %s1120_s22, 2  ;;  %v895_v1 = vld [vmem:[#allocation2 + $0x74] ss:$8 sps:$4 sm:$0xff]   ;;  %v897_v2 = vld [vmem:[#allocation2 + $0x70] ss:$8 sps:$4 sm:$0xff]   ;;  %v279_v35 = vlaneseq }
  0x35   : > { %1038 = vsyncadd (%p1269_p9), [#allocation6], 4294965248  ;;  %413 = vmatprep.mubr.bf16.mxu0 %v1065_v0  ;;  %p250_p12 = scmp.lt.s32.totalorder %s757_s6, 7  ;;  %381 = vmatprep.subr.bf16.mxu0 %v895_v1  ;;  %v898_v3 = vld [vmem:[#allocation2 + $0x64] ss:$8 sps:$4 sm:$0xff]   ;;  %v921_v11 = vld [vmem:[#allocation5 + $0x78] sm:$0xff]  }
  0x36   : > { %382 = vmatpush1.bf16.msra.mxu0 %v897_v2  ;;  %v900_v4 = vld [vmem:[#allocation2 + $0x60] ss:$8 sps:$4 sm:$0xff]   ;;  %v901_v5 = vld [vmem:[#allocation2 + $0x54] ss:$8 sps:$4 sm:$0xff]   ;;  %v903_v6 = vld [vmem:[#allocation2 + $0x50] ss:$8 sps:$4 sm:$0xff]   ;;  %800 = vmatprep.subr.bf16.mxu1 %v921_v11 }
  0x37   : > { %s1276_s6 = smov (!%p250_p12, %s757_s6), 7  ;;  %383 = vmatprep.subr.bf16.mxu0 %v898_v3  ;;  %v904_v7 = vld [vmem:[#allocation2 + $0x44] ss:$8 sps:$4 sm:$0xff]   ;;  %v906_v8 = vld [vmem:[#allocation2 + $0x40] ss:$8 sps:$4 sm:$0xff]   ;;  %v922_v13 = vld [vmem:[#allocation5 + $0x38] sm:$0xff]  }
  0x38   : > { %s758_s30 = sshll.u32 %s1276_s6, 2  ;;  %v907_v9 = vld [vmem:[#allocation2 + $0x34] ss:$8 sps:$4 sm:$0xff]   ;;  %v909_v10 = vld [vmem:[#allocation2 + $0x30] ss:$8 sps:$4 sm:$0xff]   ;;  %801 = vmatpush3.bf16.msra.mxu1 %v922_v13  ;;  %v925_v16 = vld [vmem:[#allocation5 + $0x68] sm:$0xff]  }
  0x39   : > { %s1192_s9 = scalar_lea.vmem %s1255_s0, %s758_s30  ;;  %v910_v12 = vld [vmem:[#allocation2 + $0x24] ss:$8 sps:$4 sm:$0xff]   ;;  %v923_v14 = vld [vmem:[#allocation5 + $0x70] sm:$0xff]   ;;  %v912_v17 = vld [vmem:[#allocation2 + $0x20] ss:$8 sps:$4 sm:$0xff]   ;;  %v280_v36 = vshrl.u32 %v279_v35, 7 }
  0x3a   : > { %384 = vmatpush1.bf16.msra.mxu0 %v900_v4  ;;  %v924_v15 = vld [vmem:[#allocation5 + $0x30] sm:$0xff]   ;;  %802 = vmatprep.subr.bf16.mxu1 %v923_v14  ;;  %v926_v19 = vld [vmem:[#allocation5 + $0x28] sm:$0xff]   ;;  %v927_v20 = vld [vmem:[#allocation5 + $0x60] sm:$0xff]   ;;  %s246_s12 = sand.u32 1, %s1049_s19   ;;  %s799_s23 = sshll.u32 %s1120_s22, 9 }
  0x3b   : > { %385 = vmatprep.subr.bf16.mxu0 %v901_v5  ;;  %v913_v18 = vld [vmem:[#allocation2 + $0x14] ss:$8 sps:$4 sm:$0xff]   ;;  %v915_v21 = vld [vmem:[#allocation2 + $0x10] ss:$8 sps:$4 sm:$0xff]   ;;  %v916_v22 = vld [vmem:[#allocation2 + $0x4] ss:$8 sps:$4 sm:$0xff]   ;;  %s1211_s6 = scalar_lea.hbm %s1260_s5, %s799_s23 }
  0x3c   : > { %803 = vmatpush3.bf16.msra.mxu1 %v924_v15  ;;  %v928_v23 = vld [vmem:[#allocation5 + $0x20] sm:$0xff]   ;;  %v920_v26 = vld [vmem:[%s1192_s9 + $0x8] sm:$0xff]   ;;  %v929_v27 = vld [vmem:[#allocation5 + $0x58] sm:$0xff]   ;;  %v285_v37 = vsub.s32 1, %v280_v36  ;;  %v281_v38 = vsub.s32 0, %v280_v36  ;;  %s756_s15 = sshll.u32 %s246_s12, 5 }
  0x3d   : > { %804 = vmatprep.subr.bf16.mxu1 %v925_v16  ;;  %v918_v24 = vld [vmem:[#allocation2] ss:$8 sps:$4 sm:$0xff]   ;;  %v930_v28 = vld [vmem:[#allocation5 + $0x18] sm:$0xff]   ;;  %v931_v29 = vld [vmem:[#allocation5 + $0x50] sm:$0xff]   ;;  %s248_s16 = scalar_lea.vmem [#allocation7], %s756_s15  ;;  %s1215_s30 = scalar_lea.sflag [#allocation4], %s246_s12 }
  0x3e   : > { %386 = vmatpush1.bf16.msra.mxu0 %v903_v6  ;;  %v919_v25 = vld [vmem:[%s1192_s9] sm:$0xff]   ;;  %v932_v30 = vld [vmem:[#allocation5 + $0x10] sm:$0xff]   ;;  %v933_v31 = vld [vmem:[#allocation5 + $0x48] sm:$0xff]   ;;  %s664_s17 = sshll.u32 %s248_s16, 4  ;;  %s1066_s22 = smov [#allocation7]   ;;  %s1206_s17 = int_to_ptr.vmem [resolvable:$true] %s664_s17 }
  0x3f   : > { %387 = vmatprep.subr.bf16.mxu0 %v904_v7  ;;  %v934_v32 = vld [vmem:[#allocation5 + $0x8] sm:$0xff]   ;;  %v935_v33 = vld [vmem:[#allocation5 + $0x40] sm:$0xff]   ;;  %s989_s7 = scalar_lea.vmem %s1206_s17, 512  ;;  %s993_s8 = sshll.u32 %s1066_s22, 4  ;;  %s994_s8 = int_to_ptr.vmem [resolvable:$false] %s993_s8 }
  0x40   : > { %805 = vmatpush3.bf16.msra.mxu1 %v926_v19  ;;  %v936_v34 = vld [vmem:[#allocation5] sm:$0xff]   ;;  %p990_p10 = scmp.ne.s32.totalorder %s1206_s17, %s989_s7  ;;  %s995_s9 = scalar_lea.vmem %s994_s8, 1024 }
  0x41   : > { %806 = vmatprep.subr.bf16.mxu1 %v927_v20  ;;  %v277_v39 = vld [vmem:[%s1257_s2] sm:$0x3]  ;;  %p996_p11 = scmp.lt.s32.totalorder %s1206_s17, %s994_s8  ;;  %p997_p0 = scmp.lt.s32.totalorder %s995_s9, %s989_s7 }
  0x42   : > { %388 = vmatpush1.bf16.msra.mxu0 %v906_v8  ;;  %v286_v40 = vrot.slane %v277_v39, %v285_v37  ;;  %v282_v41 = vrot.slane %v277_v39, %v281_v38  ;;  %v777_v15 = vld [vmem:[%s1259_s4] ss:$0 sm:$0xff]  ;;  %p991_p7 = pnand %p990_p10, %p1137_p5 }
  0x43   : > { %389 = vmatprep.subr.bf16.mxu0 %v907_v9  ;;  %p998_p1 = por %p997_p0, %p996_p11 }
  0x44   : > { %807 = vmatpush3.bf16.msra.mxu1 %v928_v23  ;;  %p992_p8 = pneg %p991_p7 }
  0x45   : > { %808 = vmatprep.subr.bf16.mxu1 %v929_v27 }
  0x46   : > { %390 = vmatpush1.bf16.msra.mxu0 %v909_v10  ;;  %p999_p3 = pnand %p998_p1, %p992_p8 }
  0x47   : > { %391 = vmatprep.subr.bf16.mxu0 %v910_v12 }
  0x48   : > { %809 = vmatpush3.bf16.msra.mxu1 %v930_v28 }
  0x49   : > { %810 = vmatprep.subr.bf16.mxu1 %v931_v29 }
  0x4a   : > { %392 = vmatpush1.bf16.msra.mxu0 %v912_v17 }
  0x4b   : > { %393 = vmatprep.subr.bf16.mxu0 %v913_v18 }
  0x4c   : > { %811 = vmatpush3.bf16.msra.mxu1 %v932_v30 }
  0x4d   : > { %812 = vmatprep.subr.bf16.mxu1 %v933_v31 }
  0x4e   : > { %394 = vmatpush1.bf16.msra.mxu0 %v915_v21 }
  0x4f   : > { %395 = vmatprep.subr.bf16.mxu0 %v916_v22 }
  0x50   : > { %813 = vmatpush3.bf16.msra.mxu1 %v934_v32 }
  0x51   : > { %814 = vmatprep.subr.bf16.mxu1 %v935_v33 }
  0x52   : > { %396 = vmatpush1.bf16.msra.mxu0 %v918_v24 }
  0x54   : > { %815 = vmatpush3.bf16.msra.mxu1 %v936_v34 }
  0x55   : > { %414 = vmatmul.mubr.bf16.vlgmr.msra.gmra.mxu0 %v919_v25 }
  0x56   : > { %423 = vmatprep.mubr.bf16.mxu0 %v1065_v0 }
  0x5d   : > { %424 = vmatmul.mubr.bf16.gmra.mxu0 %v920_v26 }
 0x115   : > { %v415_v42 = vpop.f32.mrf.mxu0 }
 0x116   : > { %v416_v45 = vadd.f32 %v415_v42, %v282_v41 }
 0x117   : > { %v417_v43 = vpop.f32.mrf.mxu0 }
 0x118   : > { %v418_v44 = vadd.f32 %v417_v43, %v286_v40  ;;  %v434_v52 = vmul.f32 0.01, %v416_v45 }
 0x119   : > { %v419_v46 = vpop.f32.mrf.mxu0 }
 0x11a   : > { %v420_v47 = vadd.f32 %v419_v46, %v282_v41  ;;  %v435_v49 = vmul.f32 0.01, %v418_v44  ;;  %v442_v60 = vmax.f32 %v416_v45, %v434_v52 }
 0x11b   : > { %v421_v48 = vpop.f32.mrf.mxu0 }
 0x11c   : > { %v436_v50 = vmul.f32 0.01, %v420_v47  ;;  %v422_v51 = vadd.f32 %v421_v48, %v286_v40  ;;  %v443_v58 = vmax.f32 %v418_v44, %v435_v49 }
 0x11d   : > { %v425_v53 = vpop.f32.mrf.mxu0 }
 0x11e   : > { %v437_v54 = vmul.f32 0.01, %v422_v51  ;;  %v444_v55 = vmax.f32 %v420_v47, %v436_v50  ;;  %v426_v61 = vadd.f32 %v425_v53, %v282_v41 }
 0x11f   : > { %v427_v56 = vpop.f32.mrf.mxu0 }
 0x120   : > { %v428_v57 = vadd.f32 %v427_v56, %v286_v40  ;;  %v445_v59 = vmax.f32 %v422_v51, %v437_v54  ;;  %v450_v2 = vpack.c.bf16 %v444_v55, %v442_v60  ;;  %v438_v6 = vmul.f32 0.01, %v426_v61 }
 0x121   : > { %v429_v62 = vpop.f32.mrf.mxu0 }
 0x122   : > { %v430_v63 = vadd.f32 %v429_v62, %v282_v41  ;;  %v451_v0 = vpack.c.bf16 %v445_v59, %v443_v58  ;;  %v439_v3 = vmul.f32 0.01, %v428_v57  ;;  %v446_v11 = vmax.f32 %v426_v61, %v438_v6 }
 0x123   : > { %v431_v1 = vpop.f32.mrf.mxu0 }
 0x124   : > { %v440_v4 = vmul.f32 0.01, %v430_v63  ;;  %v432_v5 = vadd.f32 %v431_v1, %v286_v40  ;;  %621 = vmatprep.mubr.bf16.mxu1 %v451_v0  ;;  %v447_v9 = vmax.f32 %v428_v57, %v439_v3 }
 0x125   : > { %622 = vmatmul.mubr.bf16.vlgmr.msra.gmra.mxu1 %v450_v2 }
 0x126   : > { %v441_v7 = vmul.f32 0.01, %v432_v5  ;;  %v448_v8 = vmax.f32 %v430_v63, %v440_v4 }
 0x128   : > { %v449_v10 = vmax.f32 %v432_v5, %v441_v7  ;;  %v452_v13 = vpack.c.bf16 %v448_v8, %v446_v11 }
 0x12a   : > { %v453_v12 = vpack.c.bf16 %v449_v10, %v447_v9 }
 0x12c   : > { %629 = vmatprep.mubr.bf16.mxu1 %v453_v12 }
 0x12d   : > { %630 = vmatmul.mubr.bf16.gmra.mxu1 %v452_v13 }
 0x1e5   : > { %v816_v14 = vpop.f32.mrf.mxu1 }
 0x1e7   : > { %v817_v16 = vpop.f32.mrf.mxu1 }
 0x1e8   : > { %v818_v17 = vadd.f32 %v817_v16, %v816_v14 }
 0x1e9   : > { %v819_v18 = vpop.f32.mrf.mxu1 }
 0x1ea   : > { %v624_v19 = vadd.f32 %v818_v17, %v777_v15 }
 0x1eb   : > { %v820_v20 = vpop.f32.mrf.mxu1 }
 0x1ec   : > { %v638_v21 = vmul.f32 0.01, %v624_v19  ;;  %v821_v22 = vadd.f32 %v820_v20, %v819_v18 }
 0x1ed   : > { %v822_v23 = vpop.f32.mrf.mxu1 }
 0x1ee   : > { %v642_v24 = vmax.f32 %v624_v19, %v638_v21  ;;  %v627_v25 = vadd.f32 %v821_v22, %v777_v15 }
 0x1ef   : > { %v823_v26 = vpop.f32.mrf.mxu1 }
 0x1f0   : > { %646 = vst [vmem:[%s248_s16] sm:$0xff] %v642_v24  ;;  %v639_v27 = vmul.f32 0.01, %v627_v25  ;;  %v824_v28 = vadd.f32 %v823_v26, %v822_v23 }
 0x1f1   : > { %v825_v29 = vpop.f32.mrf.mxu1 }
 0x1f2   : > { %v643_v30 = vmax.f32 %v627_v25, %v639_v27  ;;  %v632_v31 = vadd.f32 %v824_v28, %v777_v15 }
 0x1f3   : > { %v826_v32 = vpop.f32.mrf.mxu1 }
 0x1f4   : > { %647 = vst [vmem:[%s248_s16 + $0x8] sm:$0xff] %v643_v30  ;;  %v640_v33 = vmul.f32 0.01, %v632_v31  ;;  %v827_v34 = vadd.f32 %v826_v32, %v825_v29 }
 0x1f6   : > { %v644_v35 = vmax.f32 %v632_v31, %v640_v33  ;;  %v635_v36 = vadd.f32 %v827_v34, %v777_v15 }
 0x1f8   : > { %648 = vst [vmem:[%s248_s16 + $0x10] sm:$0xff] %v644_v35  ;;  %v641_v37 = vmul.f32 0.01, %v635_v36 }
 0x1fa   : > { %v645_v38 = vmax.f32 %v635_v36, %v641_v37 }
 0x1fc   : > { %649 = vst [vmem:[%s248_s16 + $0x18] sm:$0xff] %v645_v38 }
 0x1fd   : > { %1002 = shalt.err (!%p999_p3)
}
 0x1fe   : > { %s1003_s10 = scalar_lea.hbm %s1211_s6, 512  ;;  %s1007_s13 = scalar_lea.hbm %s1260_s5, 1024 }
 0x1ff   : > { %p1004_p2 = scmp.ne.s32.totalorder %s1211_s6, %s1003_s10  ;;  %p1008_p6 = scmp.lt.s32.totalorder %s1211_s6, %s1260_s5 }
 0x200   : > { %p1009_p9 = scmp.lt.s32.totalorder %s1007_s13, %s1003_s10 }
 0x201   : > { %p1005_p4 = pnand %p1004_p2, %p1137_p5 }
 0x202   : > { %p1010_p12 = por %p1009_p9, %p1008_p6 }
 0x203   : > { %p1006_p13 = pneg %p1005_p4 }
 0x205   : > { %p1011_p10 = pnand %p1010_p12, %p1006_p13 }
 0x207   : > { %1014 = shalt.err (!%p1011_p10)
}
 0x208   : > { %s1067_s16 = smov 128   ;;  %s1068_s23 = smov 8  }
 0x209   : > { %836 = dma.vmem_to_hbm [thread:$0]  (%p1137_p5), %s1206_s17, 512, %s1211_s6, %s1215_s30, %s1067_s16, %s1067_s16, %s1068_s23  }
 0x20a PF: > { %p853_p7 = scmp.ge.s32.totalorder %s1057_s21, 2  ;;  %s679_s25 = sand.u32 1, %s1045_s18  }
 0x20b   : > { %p1270_p8 = scmp.ne.s32.totalorder %s1263_s29, 0  ;;  %s680_s26 = scalar_lea.sflag [#allocation4], %s679_s25 }
 0x20d   : > { %p846_p11 = pnand %p853_p7, %p1270_p8 }
 0x20f   : > { %p847_p0 = pneg %p846_p11 }
 0x211   : > { %1040 = dma.done.wait (%p847_p0), %s680_s26, 512  }
 0x212   : > { %1042 = vsyncadd (%p847_p0), %s680_s26, 4294966784  ;;  %p17_p1 = scmp.ge.s32.totalorder %s1124_s24, 4   ;;  %s1271_s18 = smov %s1049_s19 }
 0x213   : > { %s1272_s19 = smov %s1053_s20  ;;  %s1273_s20 = smov %s1135_s27 }
 0x214   : > { %s1274_s21 = smov %s1124_s24  ;;  %19 = sbr.rel (!%p17_p1) target bundleno = 5 (0x5), region = 84 }
 0x219   :  { %685 = vsyncpa [#allocation3], 1 }
 0x21a   :  { %687 = vsyncpa [#allocation3 + $0x1], 1 }
 0x21b   :  { %688 = vsyncpa [#allocation6], 1 }
 0x21c   :  { %689 = vsyncpa [#allocation4], 1 }
 0x21d   :  { %691 = vsyncpa [#allocation4 + $0x1], 1 }

</bundles_post_ra>
